<compile_context>
chip_gen: v7x
topology: tpu7x:2x2x1
jax: 0.10.0
libtpu: 0.0.40
codegen_flags: <defaults>
</compile_context>

<pallas_src>
import jax
import jax.numpy as jnp
from jax.experimental import pallas as pl
from jax.experimental.pallas import tpu as pltpu

LEAKY_SLOPE = 0.01   # nn.LeakyReLU default
BN_EPS = 1e-5        # nn.BatchNorm1d default
OUT_PAD = 128        # lane-dense width for the final (256,1) linear output


def _round_up(x, m):
    return ((x + m - 1) // m) * m


# --------------------------------------------------------------------------- #
# Stage 1 kernel: collapsed DenseGCNConv + sum pooling (MXU-free streaming)
# --------------------------------------------------------------------------- #
def _gcn_pool_kernel(adj_ref, x_ref, out_ref):
    """Writes cx[b, :] = c_b @ X_b, where
         c_b[m] = dinv_b[m] * sum_n adj_l[b,n,m] * dinv_b[n],
       adj_l = adj with its diagonal forced to 1 (DenseGCNConv add_loop),
       dinv  = deg(adj_l).clamp(min=1) ** -0.5.
       The trailing (F,H) weight / N*bias is applied in the head kernel, so
       pooled_b = cx_b @ W + N*b  ==  sum_n DenseGCNConv(X, A)[b, n, :]."""
    adj = adj_ref[...].astype(jnp.float32)          # (tb, N, N)
    x = x_ref[...]                                  # (tb, N, Fp)
    N = adj.shape[1]

    row = jax.lax.broadcasted_iota(jnp.int32, (N, N), 0)
    col = jax.lax.broadcasted_iota(jnp.int32, (N, N), 1)
    eye = (row == col).astype(jnp.float32)          # (N, N)

    row_sum = jnp.sum(adj, axis=2)                  # (tb, N)
    diag = jnp.sum(adj * eye, axis=2)               # (tb, N) = adj[:, n, n]

    # adj_l row sums without materializing adj_l; clamp(min=1) as in DenseGCNConv.
    deg = jnp.maximum(row_sum - diag + 1.0, 1.0)
    dinv = jax.lax.rsqrt(deg)                       # (tb, N)

    # sum_n adj_l[b, n, m] * dinv[b, n]  (diagonal term corrected to 1 * dinv[b, m])
    col_w = jnp.sum(adj * dinv[:, :, None], axis=1)
    col_w = col_w + (1.0 - diag) * dinv
    c = dinv * col_w                                # (tb, N)

    cx = jnp.sum(c[:, :, None] * x.astype(jnp.float32), axis=1)   # (tb, Fp)
    out_ref[...] = cx.reshape(out_ref.shape).astype(out_ref.dtype)


# --------------------------------------------------------------------------- #
# Stage 2 kernel: batched MLP head (grid-less, weights touched once)
# --------------------------------------------------------------------------- #
def _head_kernel(cx_ref, wg_ref, bgn_ref, w1_ref, b1_ref,
                 w2_ref, b2_ref, w3_ref, b3_ref, out_ref):
    def lrelu(z):
        return jnp.where(z >= 0, z, LEAKY_SLOPE * z)

    mxu_dt = wg_ref.dtype   # bf16 weights -> bf16 MXU operands, f32 accumulation

    pooled = jnp.dot(cx_ref[...].astype(mxu_dt), wg_ref[...],
                     preferred_element_type=jnp.float32) + bgn_ref[...]
    z = lrelu(jnp.dot(pooled.astype(mxu_dt), w1_ref[...],
                      preferred_element_type=jnp.float32) + b1_ref[...])
    z = lrelu(jnp.dot(z.astype(mxu_dt), w2_ref[...],
                      preferred_element_type=jnp.float32) + b2_ref[...])
    z = jnp.dot(z.astype(mxu_dt), w3_ref[...],
                preferred_element_type=jnp.float32) + b3_ref[...]
    out_ref[...] = z.astype(out_ref.dtype)


# --------------------------------------------------------------------------- #
# Host-side parameter folding / padding
# --------------------------------------------------------------------------- #
def _fold_bn_into_linears(params):
    (wg, bg,
     w1, b1, g1, be1, rm1, rv1,
     w2, b2, g2, be2, rm2, rv2,
     w3, b3) = params
    s1 = g1 * jax.lax.rsqrt(rv1 + BN_EPS)
    w1f = w1 * s1
    b1f = (b1 - rm1) * s1 + be1
    s2 = g2 * jax.lax.rsqrt(rv2 + BN_EPS)
    w2f = w2 * s2
    b2f = (b2 - rm2) * s2 + be2
    return wg, bg, w1f, b1f, w2f, b2f, w3, b3


def _prepare_params(params, n_nodes, f_pad, weight_dtype):
    wg, bg, w1f, b1f, w2f, b2f, w3, b3 = _fold_bn_into_linears(params)
    F, H = wg.shape
    Hp = _round_up(H, 128)
    wg_p = jnp.pad(wg, ((0, f_pad - F), (0, Hp - H))).astype(weight_dtype)
    bgn_p = float(n_nodes) * jnp.pad(bg, ((0, 0), (0, Hp - H)))      # sum-pooled bias
    w1_p = jnp.pad(w1f, ((0, Hp - H), (0, 0))).astype(weight_dtype)
    w3_p = jnp.pad(w3, ((0, 0), (0, OUT_PAD - w3.shape[1]))).astype(weight_dtype)
    b3_p = jnp.pad(b3, ((0, 0), (0, OUT_PAD - b3.shape[1])))
    return (wg_p, bgn_p, w1_p, b1f, w2f.astype(weight_dtype), b2f, w3_p, b3_p)


# --------------------------------------------------------------------------- #
# Generation-aware VMEM budgeting / batch-tile selection
# --------------------------------------------------------------------------- #
def _tpu_vmem_capacity_bytes():
    try:
        return int(pltpu.get_tpu_info().vmem_capacity_bytes)
    except Exception:
        pass
    try:
        kind = jax.devices()[0].device_kind.lower()
    except Exception:
        kind = ""
    if "v7" in kind:
        return 64 * 1024 * 1024          # v7x per-TC VMEM
    return 128 * 1024 * 1024             # v5e / v6e


def _choose_batch_tile(B, N, Fp, in_itemsize, budget_bytes):
    """Largest divisor of B, capped at B//2 (>=2 grid steps so v7x's two
    TensorCores both get work), whose tile + f32 temporaries fit the budget."""
    max_tile = B if B == 1 else B // 2
    best = 1
    for cand in range(1, max_tile + 1):
        if B % cand:
            continue
        per_graph = N * N + N * Fp
        per_step = (2 * cand * per_graph * in_itemsize   # double-buffered input tiles
                    + 8 * cand * per_graph               # f32 in-kernel temporaries
                    + 2 * cand * Fp * 4)                 # double-buffered output tile
        if per_step <= budget_bytes:
            best = cand
    return best


# --------------------------------------------------------------------------- #
# Wrapper
# --------------------------------------------------------------------------- #
def discriminator_forward(adj, features, params, *, batch_tile=None,
                          input_dtype=jnp.bfloat16, weight_dtype=jnp.bfloat16):
    """adj: (B, N, N), features: (B, N, F) -> (B, 1) float32."""
    B, N, _ = adj.shape
    F = features.shape[-1]
    Fp = _round_up(F, 128)                       # lane-dense feature width

    capacity = _tpu_vmem_capacity_bytes()
    vmem_limit = int(min(100 * 1024 * 1024,
                         max(16 * 1024 * 1024, (capacity * 3) // 4)))

    (wg_p, bgn_p, w1_p, b1_p, w2_p, b2_p, w3_p, b3_p) = _prepare_params(
        params, N, Fp, weight_dtype)

    adj_in = adj.astype(input_dtype)
    x_in = jnp.pad(features, ((0, 0), (0, 0), (0, Fp - F))).astype(input_dtype)

    in_itemsize = jnp.dtype(input_dtype).itemsize
    if batch_tile is None:
        batch_tile = _choose_batch_tile(B, N, Fp, in_itemsize, capacity // 3)
    tb = batch_tile
    assert B % tb == 0, "batch_tile must divide the batch size"
    grid = (B // tb,)

    # --- Stage 1: streaming GCN collapse -> per-graph weighted feature sums ---
    gcn_spec = pltpu.PrefetchScalarGridSpec(
        num_scalar_prefetch=0,
        grid=grid,
        in_specs=[
            pl.BlockSpec((tb, N, N), lambda i: (i, 0, 0)),    # adj tile
            pl.BlockSpec((tb, N, Fp), lambda i: (i, 0, 0)),   # features tile
        ],
        out_specs=pl.BlockSpec((tb, 1, Fp), lambda i: (i, 0, 0)),
    )
    cx = pl.pallas_call(
        _gcn_pool_kernel,
        out_shape=jax.ShapeDtypeStruct((B, 1, Fp), jnp.float32),
        grid_spec=gcn_spec,
        compiler_params=pltpu.CompilerParams(
            dimension_semantics=("parallel",),
            vmem_limit_bytes=vmem_limit),
    )(adj_in, x_in)[:, 0, :]                                  # (B, Fp)

    # --- Stage 2: grid-less batched MLP head (one well-shaped matmul chain) ---
    out_padded = pl.pallas_call(
        _head_kernel,
        out_shape=jax.ShapeDtypeStruct((B, OUT_PAD), jnp.float32),
    )(cx, wg_p, bgn_p, w1_p, b1_p, w2_p, b2_p, w3_p, b3_p)

    return out_padded[:, :1]


# --------------------------------------------------------------------------- #
# Reference (pure JAX, unfolded params) + synthetic parameters
# --------------------------------------------------------------------------- #
def _reference_forward(adj, features, params):
    (wg, bg, w1, b1, g1, be1, rm1, rv1,
     w2, b2, g2, be2, rm2, rv2, w3, b3) = params
    adj = adj.astype(jnp.float32)
    x = features.astype(jnp.float32)
    N = adj.shape[-1]
    eye = jnp.eye(N, dtype=jnp.float32)
    adj_l = adj * (1.0 - eye) + eye
    deg = jnp.maximum(adj_l.sum(-1), 1.0)
    dinv = deg ** -0.5
    adj_n = dinv[:, :, None] * adj_l * dinv[:, None, :]
    h = jnp.einsum('bnm,bmf,fh->bnh', adj_n, x, wg) + bg
    pooled = h.sum(axis=1)       # graph_pooling('mean') in the reference SUMS

    def bn(z, g, b, rm, rv):
        return (z - rm) / jnp.sqrt(rv + BN_EPS) * g + b

    def lrelu(z):
        return jnp.where(z >= 0, z, LEAKY_SLOPE * z)

    z = lrelu(bn(pooled @ w1 + b1, g1, be1, rm1, rv1))
    z = lrelu(bn(z @ w2 + b2, g2, be2, rm2, rv2))
    return z @ w3 + b3


def init_params(key, x_dim, h_dim):
    """Deterministic synthetic parameters matching the module's layer shapes."""
    ks = jax.random.split(key, 10)

    def lin(k, fan_in, fan_out):
        bound = 1.0 / jnp.sqrt(fan_in)
        kw, kb = jax.random.split(k)
        w = jax.random.uniform(kw, (fan_in, fan_out), jnp.float32, -bound, bound)
        b = jax.random.uniform(kb, (1, fan_out), jnp.float32, -bound, bound)
        return w, b

    wg = jax.random.uniform(ks[0], (x_dim, h_dim), jnp.float32,
                            -1.0 / jnp.sqrt(x_dim), 1.0 / jnp.sqrt(x_dim))
    bg = jnp.zeros((1, h_dim), jnp.float32)

    w1, b1 = lin(ks[1], h_dim, 512)
    w2, b2 = lin(ks[2], 512, 256)
    w3, b3 = lin(ks[3], 256, 1)

    g1, be1 = jnp.ones((1, 512), jnp.float32), jnp.zeros((1, 512), jnp.float32)
    rm1, rv1 = jnp.zeros((1, 512), jnp.float32), jnp.ones((1, 512), jnp.float32)
    g2, be2 = jnp.ones((1, 256), jnp.float32), jnp.zeros((1, 256), jnp.float32)
    rm2, rv2 = jnp.zeros((1, 256), jnp.float32), jnp.ones((1, 256), jnp.float32)

    return (wg, bg,
            w1, b1, g1, be1, rm1, rv1,
            w2, b2, g2, be2, rm2, rv2,
            w3, b3)


if __name__ == "__main__":
    key = jax.random.PRNGKey(0)
    k_adj, k_x, k_p = jax.random.split(key, 3)

    B, N, X_DIM, H_DIM = 4, 8, 16, 32   # small shapes consistent with the module

    # Symmetric 0/1 adjacency, deterministic node features
    adj_raw = (jax.random.uniform(k_adj, (B, N, N)) > 0.5).astype(jnp.float32)
    adj = jnp.maximum(adj_raw, jnp.swapaxes(adj_raw, 1, 2))
    features = jax.random.normal(k_x, (B, N, X_DIM), dtype=jnp.float32)

    params = init_params(k_p, X_DIM, H_DIM)

    # batch_tile=2 -> grid of 2 steps, exercising the pipelined/parallel batch axis.
    out = discriminator_forward(adj, features, params, batch_tile=2)
    jax.block_until_ready(out)
    assert out.shape == (B, 1)

    # Pure-JAX reference on the same bf16-quantized inputs (unfolded BN, f32 weights).
    adj_q = adj.astype(jnp.bfloat16).astype(jnp.float32)
    x_q = features.astype(jnp.bfloat16).astype(jnp.float32)
    ref = _reference_forward(adj_q, x_q, params)
    err = float(jnp.max(jnp.abs(out - ref)))
    assert err < 5e-2, f"mismatch vs reference: max abs err = {err}"

    print("KERNEL_OK")
</pallas_src>

<mosaic_0001>
module attributes {stable_mosaic.version = 11 : i64} {
  func.func @_gcn_pool_kernel(%arg0: i32, %arg1: memref<2x8x8xbf16, #tpu.memory_space<vmem>>, %arg2: memref<2x8x128xbf16, #tpu.memory_space<vmem>>, %arg3: memref<2x1x128xf32, #tpu.memory_space<vmem>>) attributes {dimension_semantics = [#tpu.dimension_semantics<parallel>], iteration_bounds = array<i64: 2>, scalar_prefetch = 0 : i64, scratch_operands = 0 : i64, tpu.core_type = #tpu.core_type<tc>, window_params = [{transform_indices = @transform_0, window_bounds = array<i64: 2, 8, 8>}, {transform_indices = @transform_1, window_bounds = array<i64: 2, 8, 128>}, {transform_indices = @transform_2, window_bounds = array<i64: 2, 1, 128>}]} {
    %c0 = arith.constant 0 : index
    %c0_0 = arith.constant 0 : index
    %c0_1 = arith.constant 0 : index
    %0 = vector.load %arg1[%c0, %c0_0, %c0_1] : memref<2x8x8xbf16, #tpu.memory_space<vmem>>, vector<2x8x8xbf16>
    %1 = arith.extf %0 : vector<2x8x8xbf16> to vector<2x8x8xf32>
    %c0_2 = arith.constant 0 : index
    %c0_3 = arith.constant 0 : index
    %c0_4 = arith.constant 0 : index
    %2 = vector.load %arg2[%c0_2, %c0_3, %c0_4] : memref<2x8x128xbf16, #tpu.memory_space<vmem>>, vector<2x8x128xbf16>
    %3 = tpu.iota {dimensions = array<i32: 0>} : vector<8x8xi32>
    %4 = tpu.iota {dimensions = array<i32: 1>} : vector<8x8xi32>
    %5 = arith.cmpi eq, %3, %4 : vector<8x8xi32>
    %6 = arith.extui %5 : vector<8x8xi1> to vector<8x8xi32>
    %7 = arith.sitofp %6 : vector<8x8xi32> to vector<8x8xf32>
    %cst = arith.constant dense<0.000000e+00> : vector<2x8xf32>
    %8 = vector.multi_reduction <add>, %1, %cst [2] : vector<2x8x8xf32> to vector<2x8xf32>
    %9 = vector.shape_cast %7 : vector<8x8xf32> to vector<1x8x8xf32>
    %10 = vector.broadcast %9 : vector<1x8x8xf32> to vector<2x8x8xf32>
    %11 = arith.mulf %1, %10 : vector<2x8x8xf32>
    %cst_5 = arith.constant dense<0.000000e+00> : vector<2x8xf32>
    %12 = vector.multi_reduction <add>, %11, %cst_5 [2] : vector<2x8x8xf32> to vector<2x8xf32>
    %13 = arith.subf %8, %12 : vector<2x8xf32>
    %cst_6 = arith.constant 1.000000e+00 : f32
    %14 = vector.broadcast %cst_6 : f32 to vector<2x8xf32>
    %15 = arith.addf %13, %14 : vector<2x8xf32>
    %cst_7 = arith.constant 1.000000e+00 : f32
    %16 = vector.broadcast %cst_7 : f32 to vector<2x8xf32>
    %17 = arith.maximumf %15, %16 : vector<2x8xf32>
    %18 = math.rsqrt %17 : vector<2x8xf32>
    %19 = vector.shape_cast %18 : vector<2x8xf32> to vector<2x8x1xf32>
    %20 = vector.broadcast %19 : vector<2x8x1xf32> to vector<2x8x8xf32>
    %21 = arith.mulf %1, %20 : vector<2x8x8xf32>
    %cst_8 = arith.constant dense<0.000000e+00> : vector<2x8xf32>
    %22 = vector.multi_reduction <add>, %21, %cst_8 [1] : vector<2x8x8xf32> to vector<2x8xf32>
    %cst_9 = arith.constant 1.000000e+00 : f32
    %23 = vector.broadcast %cst_9 : f32 to vector<2x8xf32>
    %24 = arith.subf %23, %12 : vector<2x8xf32>
    %25 = arith.mulf %24, %18 : vector<2x8xf32>
    %26 = arith.addf %22, %25 : vector<2x8xf32>
    %27 = arith.mulf %18, %26 : vector<2x8xf32>
    %28 = vector.shape_cast %27 : vector<2x8xf32> to vector<2x8x1xf32>
    %29 = arith.extf %2 : vector<2x8x128xbf16> to vector<2x8x128xf32>
    %30 = vector.broadcast %28 : vector<2x8x1xf32> to vector<2x8x128xf32>
    %31 = arith.mulf %30, %29 : vector<2x8x128xf32>
    %cst_10 = arith.constant dense<0.000000e+00> : vector<2x128xf32>
    %32 = vector.multi_reduction <add>, %31, %cst_10 [1] : vector<2x8x128xf32> to vector<2x128xf32>
    %33 = vector.shape_cast %32 : vector<2x128xf32> to vector<2x1x128xf32>
    %c0_11 = arith.constant 0 : index
    %c0_12 = arith.constant 0 : index
    %c0_13 = arith.constant 0 : index
    %34 = vector.load %arg3[%c0_11, %c0_12, %c0_13] : memref<2x1x128xf32, #tpu.memory_space<vmem>>, vector<2x1x128xf32>
    tpu.vector_store %arg3[%c0_11, %c0_12, %c0_13], %33 {strides = array<i32>} : memref<2x1x128xf32, #tpu.memory_space<vmem>>, vector<2x1x128xf32>,
    return
  }
  func.func @transform_0(%arg0: i32) -> (i32, i32, i32) {
    %c0_i32 = arith.constant 0 : i32
    %c0_i32_0 = arith.constant 0 : i32
    %c0_i32_1 = arith.constant 0 : i32
    return %arg0, %c0_i32, %c0_i32_0 : i32, i32, i32
  }
  func.func @transform_1(%arg0: i32) -> (i32, i32, i32) {
    %c0_i32 = arith.constant 0 : i32
    %c0_i32_0 = arith.constant 0 : i32
    %c0_i32_1 = arith.constant 0 : i32
    return %arg0, %c0_i32, %c0_i32_0 : i32, i32, i32
  }
  func.func @transform_2(%arg0: i32) -> (i32, i32, i32) {
    %c0_i32 = arith.constant 0 : i32
    %c0_i32_0 = arith.constant 0 : i32
    %c0_i32_1 = arith.constant 0 : i32
    return %arg0, %c0_i32, %c0_i32_0 : i32, i32, i32
  }
}

</mosaic_0001>

<bundles_post_ra>
// kernel: tpu_custom_call.1
= control target key start
LH: loop header
LB: loop body
LE: loop exit
PB: predicated region body
PF: predicated region fallthrough
CT: control target
= control target key end

     0   :  { %7 = vsyncpa [#allocation3], 0  ;;  %s920_s0 = inlined_call_operand.hbm [shape: bf16[4,8,8], index: 0, kind: input, shape index: {}]   ;;  %s921_s1 = inlined_call_operand.hbm [shape: bf16[4,8,128], index: 1, kind: input, shape index: {}]   ;;  %s922_s2 = inlined_call_operand.hbm [shape: f32[4,1,128], index: 2, kind: output, shape index: {}]  }
   0x1   :  { %9 = vsyncpa [#allocation3 + $0x1], 0 }
   0x2   :  { %10 = vsyncpa [#allocation6], 0 }
   0x3   :  { %12 = vsyncpa [#allocation6 + $0x1], 0 }
   0x4   :  { %13 = vsyncpa [#allocation4], 0 }
   0x5   :  { %15 = vsyncpa [#allocation4 + $0x1], 0  ;;  %s682_s9 = smov 0   ;;  %s684_s10 = smov 0  }
   0x6   :  { %s686_s11 = smov 0   ;;  %s688_s12 = smov 0  }
   0x7 LB: > { %s703_s13 = sadd.s32 4294967295, %s656_s12   ;;  %s433_s14 = sadd.s32 4294967294, %s656_s12   ;;  %s656_s12 = sphi %s688_s12, %s938_s12   ;;  %s652_s11 = sphi %s686_s11, %s937_s11   ;;  %s648_s10 = sphi %s684_s10, %s936_s10   ;;  %s644_s9 = sphi %s682_s9, %s935_s9  }
   0x8   : > { %s707_s15 = sadd.s32 1, %s656_s12   ;;  %s28_s16 = sadd.s32 1, %s652_s11 }
   0x9   : > { %s25_s17 = ssub.s32 %s656_s12, %s707_s15  ;;  %p35_p0 = scmp.ne.s32.totalorder %s652_s11, %s648_s10 }
   0xa   : > { %p26_p1 = scmp.eq.s32.totalorder %s25_s17, 0  ;;  %p36_p2 = scmp.eq.s32.totalorder %s656_s12, 0 }
   0xb   : > { %p41_p3 = scmp.ne.s32.totalorder %s648_s10, %s644_s9  ;;  %p42_p4 = scmp.eq.s32.totalorder %s703_s13, 0 }
   0xc   : > { %s719_s18 = scalar_select %p26_p1, %s652_s11, %s28_s16  }
   0xd   : > { %p721_p5 = por %p36_p2, %p35_p0  ;;  %p725_p6 = por %p42_p4, %p41_p3 }
   0xe   : > { %p91_p7 = scmp.eq.s32.totalorder %s703_s13, 1  ;;  %p97_p8 = scmp.eq.s32.totalorder %s433_s14, 1 }
   0xf   : > { %s926_s20 = scalar_select %p725_p6, 1, 0 }
  0x10   : > { %p480_p10 = scmp.lt.s32.totalorder %s656_s12, 2  ;;  %p732_p11 = por %p91_p7, %p35_p0 }
  0x11   : > { %p736_p12 = por %p97_p8, %p41_p3  ;;  %s741_s23 = sand.u32 1, %s652_s11  }
  0x12   : > { %s927_s21 = scalar_select %p732_p11, 1, 0 }
  0x13   : > { %s928_s22 = scalar_select %p736_p12, 1, 0 }
  0x14   : > { %s452_s24 = sshll.u32 %s656_s12, 7  ;;  %s436_s25 = sshll.u32 %s741_s23, 3 }
  0x15   : > { %s750_s28 = scalar_lea.hbm %s920_s0, %s452_s24  ;;  %s121_s29 = scalar_lea.vmem [#allocation2], %s436_s25 }
  0x16   : > { %s128_s30 = sshll.u32 %s121_s29, 4  ;;  %p756_p13 = pnand %p480_p10, %p721_p5  ;;  %s760_s30 = int_to_ptr.vmem [resolvable:$true] %s128_s30 }
  0x17   : > { %s118_s4 = scalar_lea.sflag [#allocation3], %s741_s23  ;;  %s526_s5 = scalar_lea.hbm %s750_s28, 128 }
  0x18   : > { %p527_p0 = scmp.ne.s32.totalorder %s750_s28, %s526_s5  ;;  %p528_p1 = pneg %p756_p13 }
  0x19   : > { %s531_s8 = scalar_lea.hbm %s920_s0, 256  ;;  %p532_p4 = scmp.lt.u32.totalorder %s750_s28, %s920_s0 }
  0x1a   : > { %p529_p2 = pnand %p528_p1, %p527_p0  ;;  %p533_p5 = scmp.lt.u32.totalorder %s531_s8, %s526_s5 }
  0x1b   : > { %p535_p8 = scmp.lt.u32.totalorder %s526_s5, %s750_s28 }
  0x1c   : > { %p530_p3 = pneg %p529_p2  ;;  %p534_p7 = por %p533_p5, %p532_p4 }
  0x1e   : > { %p536_p10 = por %p535_p8, %p534_p7 }
  0x20   : > { %p537_p9 = pnand %p536_p10, %p530_p3 }
  0x22   : > { %540 = shalt.err (!%p537_p9)
}
  0x23   : > { %s541_s17 = scalar_lea.vmem %s760_s30, 128  ;;  %s658_s19 = smov [#allocation2]  }
  0x24   : > { %p542_p0 = scmp.ne.s32.totalorder %s760_s30, %s541_s17  ;;  %s546_s26 = sshll.u32 %s658_s19, 4  ;;  %s547_s26 = int_to_ptr.vmem [resolvable:$false] %s546_s26 }
  0x25   : > { %s548_s27 = scalar_lea.vmem %s547_s26, 256  ;;  %p549_p11 = scmp.lt.s32.totalorder %s760_s30, %s547_s26 }
  0x26   : > { %p544_p2 = pnand %p542_p0, %p528_p1  ;;  %p550_p4 = scmp.lt.s32.totalorder %s548_s27, %s541_s17 }
  0x28   : > { %p545_p12 = pneg %p544_p2  ;;  %p551_p5 = por %p550_p4, %p549_p11 }
  0x2a   : > { %p552_p7 = pnand %p551_p5, %p545_p12 }
  0x2c   : > { %555 = shalt.err (!%p552_p7)
}
  0x2d   : > { %s659_s29 = smov 64   ;;  %s660_s5 = smov 4  }
  0x2e   : > { %472 = dma.hbm_to_vmem [thread:$0]  (!%p756_p13), %s750_s28, 128, %s760_s30, %s118_s4, %s659_s29, %s659_s29, %s660_s5  }
  0x2f   : > { %p442_p9 = scmp.ge.s32.totalorder %s656_s12, 1  ;;  %p157_p11 = scmp.lt.s32.totalorder %s656_s12, 3 }
  0x30   : > { %s804_s14 = scalar_lea.hbm %s921_s1, %s452_s24  ;;  %s142_s16 = scalar_lea.vmem [#allocation5], %s436_s25 }
  0x31   : > { %p795_p12 = pnand %p442_p9, %p157_p11  ;;  %s149_s17 = sshll.u32 %s142_s16, 4  ;;  %s808_s17 = int_to_ptr.vmem [resolvable:$true] %s149_s17 }
  0x32   : > { %s139_s28 = scalar_lea.sflag [#allocation6], %s741_s23  ;;  %s556_s30 = scalar_lea.hbm %s804_s14, 128 }
  0x33   : > { %p557_p3 = scmp.ne.s32.totalorder %s804_s14, %s556_s30  ;;  %s561_s24 = scalar_lea.hbm %s921_s1, 256 }
  0x34   : > { %p562_p0 = scmp.lt.u32.totalorder %s804_s14, %s921_s1  ;;  %p563_p2 = scmp.lt.u32.totalorder %s561_s24, %s556_s30 }
  0x35   : > { %p559_p8 = pnand %p557_p3, %p528_p1  ;;  %p565_p5 = scmp.lt.u32.totalorder %s556_s30, %s804_s14 }
  0x36   : > { %p564_p4 = por %p563_p2, %p562_p0 }
  0x37   : > { %p560_p10 = pneg %p559_p8 }
  0x38   : > { %p566_p7 = por %p565_p5, %p564_p4 }
  0x3a   : > { %p567_p9 = pnand %p566_p7, %p560_p10 }
  0x3c   : > { %570 = shalt.err (!%p567_p9)
}
  0x3d   : > { %s571_s25 = scalar_lea.vmem %s808_s17, 128  ;;  %s661_s7 = smov [#allocation5]  }
  0x3e   : > { %p572_p11 = scmp.ne.s32.totalorder %s808_s17, %s571_s25  ;;  %s576_s8 = sshll.u32 %s661_s7, 4  ;;  %s577_s8 = int_to_ptr.vmem [resolvable:$false] %s576_s8 }
  0x3f   : > { %s578_s16 = scalar_lea.vmem %s577_s8, 256  ;;  %p579_p6 = scmp.lt.s32.totalorder %s808_s17, %s577_s8 }
  0x40   : > { %p574_p3 = pnand %p572_p11, %p528_p1  ;;  %p580_p0 = scmp.lt.s32.totalorder %s578_s16, %s571_s25 }
  0x42   : > { %p575_p8 = pneg %p574_p3  ;;  %p581_p2 = por %p580_p0, %p579_p6 }
  0x44   : > { %p582_p4 = pnand %p581_p2, %p575_p8 }
  0x46   : > { %585 = shalt.err (!%p582_p4)
}
  0x47   : > { %475 = dma.hbm_to_vmem [thread:$0]  (!%p756_p13), %s804_s14, 128, %s808_s17, %s139_s28, %s659_s29, %s659_s29, %s660_s5  }
  0x48   : > { %161 = sbr.rel (%p795_p12) target bundleno = 547 (0x223), region = 28  ;;  %s842_s30 = sand.u32 (!%p795_p12), 1, %s648_s10  }
  0x49   : > { %s443_s4 = sshll.u32 (!%p795_p12), %s842_s30, 3  ;;  %s164_s19 = scalar_lea.sflag (!%p795_p12), [#allocation3], %s842_s30 }
  0x4a   : > { %s167_s3 = scalar_lea.vmem (!%p795_p12), [#allocation2], %s443_s4  ;;  %p931_p6 = scmp.ne.s32.totalorder (!%p795_p12), %s926_s20, 0 }
  0x4f   : > { %631 = dma.done.wait (%p931_p6), %s164_s19, 128  }
  0x50   : > { %633 = vsyncadd (%p931_p6), %s164_s19, 4294967168  ;;  %s173_s23 = scalar_lea.sflag [#allocation6], %s842_s30  ;;  %s851_s29 = scalar_lea.vmem [#allocation5], %s443_s4 }
  0x51   : > { %635 = dma.done.wait (%p931_p6), %s173_s23, 128  }
  0x52   : > { %637 = vsyncadd (%p931_p6), %s173_s23, 4294967168  ;;  %v211_v0 = vlaneseq  ;;  %v456_v3 = vld [vmem:[%s167_s3] sm:$0xff]   ;;  %v662_v4 = vmov 0.0   ;;  %vm218_vm1 = vcmask 64512   ;;  %v663_v36 = vmov 0   ;;  %v460_v59 = vld [vmem:[%s851_s29] sm:$0xff]  }
  0x53   : > { %v457_v6 = vunpack.c.l.bf16 %v456_v3  ;;  %v458_v7 = vunpack.c.h.bf16 %v456_v3  ;;  %520 = vset.pattern.permute.xlu1 %v663_v36  ;;  %521 = vset.pattern.permute.xlu0 %v663_v36  ;;  %v461_v60 = vunpack.c.l.bf16 %v460_v59  ;;  %v462_v63 = vunpack.c.h.bf16 %v460_v59  ;;  %s445_s20 = sshll.u32 %s842_s30, 1  ;;  %s454_s14 = sshll.u32 %s703_s13, 5 }
  0x54   : > { %v857_v1 = vshrl.u32 %v211_v0, 7  ;;  %v214_v2 = vand.u32 127, %v211_v0  ;;  %s201_s5 = scalar_lea.vmem [#allocation7], %s445_s20  ;;  %s874_s24 = scalar_lea.hbm %s922_s2, %s454_s14 }
  0x55   : > { %v219_v9 = vsel %vm218_vm1, %v457_v6, 0.0  ;;  %v222_v12 = vsel %vm218_vm1, %v458_v7, 0.0  ;;  %s337_s6 = sshll.u32 %s201_s5, 4  ;;  %s324_s26 = scalar_lea.sflag [#allocation4], %s842_s30  ;;  %s876_s6 = int_to_ptr.vmem [resolvable:$true] %s337_s6 }
  0x56   : > { %vm215_vm0 = vcmp.eq.s32.totalorder %v857_v1, %v214_v2  ;;  %220 = vadd.xlane.f32.xlu0 %v219_v9  ;;  %v265_v14 = vsub.s32 %v214_v2, %v857_v1  ;;  %v279_v43 = vsub.s32 0, %v857_v1  ;;  %s586_s27 = scalar_lea.vmem %s876_s6, 32  ;;  %p932_p1 = scmp.ne.s32.totalorder %s927_s21, 0 }
  0x57   : > { %v446_v5 = vsel %vm215_vm0, 1.0, %v662_v4  ;;  %p587_p13 = scmp.ne.s32.totalorder %s876_s6, %s586_s27  ;;  %s664_s13 = smov [#allocation7]  }
  0x58   : > { %v225_v8 = vmul.f32 %v457_v6, %v446_v5  ;;  %v226_v10 = vmul.f32 %v458_v7, %v446_v5  ;;  %s590_s25 = sshll.u32 %s664_s13, 4  ;;  %s591_s25 = int_to_ptr.vmem [resolvable:$false] %s590_s25 }
  0x59   : > { %p588_p12 = pnand %p587_p13, %p932_p1  ;;  %s592_s7 = scalar_lea.vmem %s591_s25, 64 }
  0x5a   : > { %v227_v11 = vsel %vm218_vm1, %v225_v8, 0.0  ;;  %v230_v13 = vsel %vm218_vm1, %v226_v10, 0.0  ;;  %223 = vadd.xlane.f32.xlu0 %v222_v12  ;;  %p593_p5 = scmp.lt.s32.totalorder %s876_s6, %s591_s25  ;;  %p594_p7 = scmp.lt.s32.totalorder %s592_s7, %s586_s27 }
  0x5b   : > { %228 = vadd.xlane.f32.xlu1 %v227_v11  ;;  %p589_p10 = pneg %p588_p12 }
  0x5c   : > { %p595_p9 = por %p594_p7, %p593_p5 }
  0x5e   : > { %p596_p11 = pnand %p595_p9, %p589_p10 }
  0x5f   : > { %231 = vadd.xlane.f32.xlu1 %v230_v13 }
  0xe3   : > { %v221_v15 = vpop.xlane.xlu0 %220 }
  0xe7   : > { %v224_v18 = vpop.xlane.xlu0 %223 }
  0xe8   : > { %v229_v16 = vpop.xlane.xlu1 %228 }
  0xe9   : > { %v233_v17 = vsub.f32 %v221_v15, %v229_v16  ;;  %v257_v33 = vsub.f32 1.0, %v229_v16 }
  0xeb   : > { %v235_v19 = vadd.f32 1.0, %v233_v17 }
  0xec   : > { %v232_v20 = vpop.xlane.xlu1 %231 }
  0xed   : > { %v237_v21 = vmax.f32 %v235_v19, 1.0  ;;  %v234_v22 = vsub.f32 %v224_v18, %v232_v20  ;;  %v258_v40 = vsub.f32 1.0, %v232_v20 }
  0xef   : > { %522 = vrsqrt.f32 %v237_v21  ;;  %v236_v23 = vadd.f32 1.0, %v234_v22 }
  0xf1   : > { %v238_v24 = vmax.f32 %v236_v23, 1.0 }
  0xf3   : > { %524 = vrsqrt.f32 %v238_v24 }
  0xf9   : > { %v523_v25 = vpop.eup %522 }
  0xfa   : > { %v241_v26 = vmul.f32 %v523_v25, %v457_v6  ;;  %v259_v38 = vmul.f32 %v523_v25, %v257_v33 }
  0xfc   : > { %v243_v27 = vsel %vm218_vm1, %v241_v26, 0.0  ;;  %v266_v45 = vrot.slane %v259_v38, %v265_v14 }
  0xfd   : > { %v525_v28 = vpop.eup %524  ;;  %v244_v29 = vrot.slane %v243_v27, 4 }
  0xfe   : > { %v242_v30 = vmul.f32 %v525_v28, %v458_v7  ;;  %v260_v47 = vmul.f32 %v525_v28, %v258_v40 }
  0xff   : > { %v245_v31 = vadd.f32 %v244_v29, %v243_v27 }
 0x100   : > { %v250_v32 = vsel %vm218_vm1, %v242_v30, 0.0  ;;  %v270_v52 = vrot.slane %v260_v47, %v265_v14 }
 0x101   : > { %v246_v34 = vrot.slane %v245_v31, 2  ;;  %v251_v35 = vrot.slane %v250_v32, 4 }
 0x103   : > { %v247_v37 = vadd.f32 %v246_v34, %v245_v31  ;;  %v252_v39 = vadd.f32 %v251_v35, %v250_v32 }
 0x105   : > { %v248_v41 = vrot.slane %v247_v37, 1  ;;  %v253_v42 = vrot.slane %v252_v39, 2 }
 0x107   : > { %v249_v44 = vadd.f32 %v248_v41, %v247_v37  ;;  %v254_v46 = vadd.f32 %v253_v42, %v252_v39 }
 0x109   : > { %v273_v48 = vadd.f32 %v266_v45, %v249_v44  ;;  %v255_v49 = vrot.slane %v254_v46, 1 }
 0x10b   : > { %v280_v50 = vrot.slane %v273_v48, %v279_v43  ;;  %v256_v51 = vadd.f32 %v255_v49, %v254_v46 }
 0x10d   : > { %282 = vbcast.lane.b32.xlu0 %v280_v50, 256  ;;  %v274_v53 = vadd.f32 %v270_v52, %v256_v51 }
 0x10f   : > { %v287_v54 = vrot.slane %v274_v53, %v279_v43 }
 0x111   : > { %289 = vbcast.lane.b32.xlu1 %v287_v54, 256 }
 0x17f   : > { %v283_v55 = vpop.permute.xlu0 %282 }
 0x180   : > { %v293_v56 = vmul.f32 %v523_v25, %v283_v55 }
 0x182   : > { %299 = vperm.xlu1 %520, %v293_v56  }
 0x183   : > { %v290_v57 = vpop.permute.xlu1 %289 }
 0x184   : > { %v294_v58 = vmul.f32 %v525_v28, %v290_v57 }
 0x186   : > { %304 = vperm.xlu1 %520, %v294_v58  }
 0x201   : > { %v300_v61 = vpop.permute.xlu1 %299 }
 0x202   : > { %v307_v62 = vmul.f32 %v461_v60, %v300_v61 }
 0x204   : > { %v309_v0 = vrot.slane %v307_v62, 4 }
 0x205   : > { %v305_v1 = vpop.permute.xlu1 %304 }
 0x206   : > { %v310_v2 = vadd.f32 %v309_v0, %v307_v62  ;;  %v308_v3 = vmul.f32 %v462_v63, %v305_v1 }
 0x208   : > { %v311_v4 = vrot.slane %v310_v2, 2  ;;  %v315_v5 = vrot.slane %v308_v3, 4 }
 0x20a   : > { %v312_v6 = vadd.f32 %v311_v4, %v310_v2  ;;  %v316_v7 = vadd.f32 %v315_v5, %v308_v3 }
 0x20c   : > { %v313_v8 = vrot.slane %v312_v6, 1  ;;  %v317_v9 = vrot.slane %v316_v7, 2 }
 0x20e   : > { %v314_v10 = vadd.f32 %v313_v8, %v312_v6  ;;  %v318_v11 = vadd.f32 %v317_v9, %v316_v7 }
 0x210   : > { %321 = vst [vmem:[%s201_s5] sm:$0x1] %v314_v10  ;;  %v319_v12 = vrot.slane %v318_v11, 1 }
 0x212   : > { %v320_v13 = vadd.f32 %v319_v12, %v318_v11 }
 0x214   : > { %322 = vst [vmem:[%s201_s5 + $0x1] sm:$0x1] %v320_v13 }
 0x215   : > { %599 = shalt.err (!%p596_p11)
}
 0x216   : > { %s600_s8 = scalar_lea.hbm %s874_s24, 32  ;;  %s604_s19 = scalar_lea.hbm %s922_s2, 64 }
 0x217   : > { %p601_p3 = scmp.ne.s32.totalorder %s874_s24, %s600_s8  ;;  %p605_p2 = scmp.lt.u32.totalorder %s874_s24, %s922_s2 }
 0x218   : > { %p606_p4 = scmp.lt.u32.totalorder %s604_s19, %s600_s8  ;;  %p608_p13 = scmp.lt.u32.totalorder %s600_s8, %s874_s24 }
 0x219   : > { %p602_p8 = pnand %p601_p3, %p932_p1 }
 0x21a   : > { %p607_p6 = por %p606_p4, %p605_p2 }
 0x21b   : > { %p603_p0 = pneg %p602_p8 }
 0x21c   : > { %p609_p12 = por %p608_p13, %p607_p6 }
 0x21e   : > { %p610_p10 = pnand %p609_p12, %p603_p0 }
 0x220   : > { %613 = shalt.err (!%p610_p10)
}
 0x221   : > { %s665_s29 = smov 16   ;;  %s666_s20 = smov 1  }
 0x222   : > { %467 = dma.vmem_to_hbm [thread:$0]  (%p932_p1), %s876_s6, 32, %s874_s24, %s324_s26, %s665_s29, %s665_s29, %s666_s20  }
 0x223 PF: > { %s352_s5 = sand.u32 1, %s644_s9   ;;  %p933_p5 = scmp.ne.s32.totalorder %s928_s22, 0 }
 0x224   : > { %p934_p7 = scmp.ge.s32.totalorder %s656_s12, 2  ;;  %s353_s14 = scalar_lea.sflag [#allocation4], %s352_s5 }
 0x226   : > { %p477_p9 = pnand %p934_p7, %p933_p5 }
 0x228   : > { %639 = dma.done.wait (!%p477_p9), %s353_s14, 32  }
 0x229   : > { %641 = vsyncadd (!%p477_p9), %s353_s14, 4294967264  ;;  %p18_p11 = scmp.ge.s32.totalorder %s707_s15, 4   ;;  %s935_s9 = smov %s648_s10 }
 0x22a   : > { %s936_s10 = smov %s652_s11  ;;  %s937_s11 = smov %s719_s18 }
 0x22b   : > { %s938_s12 = smov %s707_s15  ;;  %20 = sbr.rel (!%p18_p11) target bundleno = 7 (0x7), region = 86 }
 0x232   :  { %358 = vsyncpa [#allocation3], 1 }
 0x233   :  { %360 = vsyncpa [#allocation3 + $0x1], 1 }
 0x234   :  { %361 = vsyncpa [#allocation6], 1 }
 0x235   :  { %363 = vsyncpa [#allocation6 + $0x1], 1 }
 0x236   :  { %364 = vsyncpa [#allocation4], 1 }
 0x237   :  { %366 = vsyncpa [#allocation4 + $0x1], 1 }

</bundles_post_ra>
